<compile_context>
chip_gen: v7x
topology: tpu7x:2x2x1
jax: 0.10.0
libtpu: 0.0.40
codegen_flags: <defaults>
</compile_context>

<pallas_src>
import functools
import math

import jax
import jax.numpy as jnp
from jax import lax
from jax.experimental import pallas as pl
from jax.experimental.pallas import tpu as pltpu


def _matmul_lt(x_lt, w_ld):
    """(L, T) x (L, D) -> (T, D), contracting dim 0 of both (the fused 'permute')."""
    return lax.dot_general(
        x_lt,
        w_ld,
        dimension_numbers=(((0,), (0,)), ((), ())),
        preferred_element_type=jnp.float32,
    )


def _cast(a, compute_dtype):
    if compute_dtype is None or a.dtype == compute_dtype:
        return a
    return a.astype(compute_dtype)


def _embed_kernel(x_ref, w_ref, b_ref, o_ref, *, compute_dtype):
    # x_ref: (1, L, TV) slice of x[b, :, t0:t0+TV];  w_ref: (L, D);  b_ref: (1, D).
    # Junk columns of a partial last block produce junk output rows >= N, which the
    # masked partial-block output store drops.
    y = _matmul_lt(_cast(x_ref[0], compute_dtype), _cast(w_ref[...], compute_dtype))
    o_ref[0] = (y + b_ref[...]).astype(o_ref.dtype)


def _embed_mark_tiled_kernel(x_ref, xm_ref, w_ref, b_ref, o_ref, *, n_vars, compute_dtype):
    # Tiled over the token axis of the *virtual* concat [x^T ; x_mark^T] without ever
    # materializing it.  Output tile j covers global token rows [j*TV, (j+1)*TV):
    #   rows g <  n_vars -> columns of the x block
    #   rows g >= n_vars -> x_mark rows (g - n_vars), placed via a one-hot matmul.
    j = pl.program_id(1)
    tv = o_ref.shape[1]
    m = xm_ref.shape[2]
    row0 = j * tv
    w = _cast(w_ref[...], compute_dtype)

    # Steady-state tiles (entirely below the x / x_mark boundary): plain x^T @ W + b.
    @pl.when(row0 + tv <= n_vars)
    def _():
        y = _matmul_lt(_cast(x_ref[0], compute_dtype), w)
        o_ref[0] = (y + b_ref[...]).astype(o_ref.dtype)

    # Boundary / overflow tile(s): contain some (or only) time-feature rows.  All the
    # mark-path work lives only here, so steady-state tiles pay nothing for it.
    @pl.when(row0 + tv > n_vars)
    def _():
        y_x = _matmul_lt(_cast(x_ref[0], compute_dtype), w)              # (TV, D); junk rows >= N
        y_m = _matmul_lt(_cast(xm_ref[0], compute_dtype), w)             # (M, D) tiny
        g = row0 + lax.broadcasted_iota(jnp.int32, (tv, 1), 0)           # (TV, 1) global row id
        mark_rows = n_vars + lax.broadcasted_iota(jnp.int32, (1, m), 1)  # (1, M)
        sel = (g == mark_rows).astype(jnp.float32)                       # (TV, M) one-hot
        y_m_placed = jnp.dot(sel, y_m, preferred_element_type=jnp.float32)  # (TV, D)
        # select (not multiply-mask), so junk rows from padded x columns are harmless;
        # rows >= V are dropped by the masked partial-block output store.
        y = jnp.where(g < n_vars, y_x, y_m_placed) + b_ref[...]
        o_ref[0] = y.astype(o_ref.dtype)


def _embed_mark_full_kernel(x_ref, xm_ref, w_ref, b_ref, o_ref, *, compute_dtype):
    # Small-N fallback: whole [V, D] tile per batch element (all blocks use full array
    # dims, so no (8,128) tiling constraints at tiny shapes).
    n = x_ref.shape[2]
    w = _cast(w_ref[...], compute_dtype)
    y_x = _matmul_lt(_cast(x_ref[0], compute_dtype), w) + b_ref[...]   # (N, D)
    y_m = _matmul_lt(_cast(xm_ref[0], compute_dtype), w) + b_ref[...]  # (M, D)
    o_ref[0, :n, :] = y_x.astype(o_ref.dtype)
    o_ref[0, n:, :] = y_m.astype(o_ref.dtype)


def _vmem_capacity_bytes():
    """Physical VMEM per TensorCore; conservative (v7x = 64 MiB) fallback if unknown."""
    cap = 64 * 1024 * 1024
    try:
        info = pltpu.get_tpu_info()
        got = getattr(info, "vmem_capacity_bytes", None)
        if got:
            cap = int(got)
    except Exception:
        pass
    return cap


def _auto_tile_and_vmem(L, D, M, V, x_bytes, w_bytes, out_bytes):
    """Pick the token tile from a generation-aware VMEM budget."""
    cap = _vmem_capacity_bytes()
    # ~48 MiB scoped budget on v7x (64 MiB physical), ~96 MiB on v5e/v6e (128 MiB).
    budget = min((cap * 3) // 4, 96 * 1024 * 1024)
    # Per-step footprint, everything counted double-buffered, ~15% slack for scratch.
    fixed = 2 * (L * D * w_bytes + 4 * D + L * M * x_bytes)
    per_tv = 2 * (L * x_bytes + D * out_bytes)
    usable = int(budget * 0.85) - fixed
    tv = usable // per_tv if per_tv > 0 else 2048
    tv = max(256, min(2048, (tv // 256) * 256))   # multiple of 256 (v6e MXU output rows)
    tv = min(tv, pl.cdiv(V, 128) * 128)           # no benefit past the (padded) token count
    tv = max(128, tv)
    return int(tv), int(budget)


def data_embedding_inverted(
    x,
    x_mark,
    weight,
    bias,
    *,
    token_tile=None,
    compute_dtype=None,
    vmem_limit_bytes=None,
):
    """
    x:      [B, L, N]
    x_mark: [B, L, M] or None
    weight: [D, L]  (PyTorch nn.Linear weight layout, c_in = L)
    bias:   [D]
    returns [B, N(+M), D]  (same dtype as x)
    """
    B, L, N = x.shape
    D = weight.shape[0]
    if x_mark is not None and x_mark.shape[2] == 0:
        x_mark = None
    M = 0 if x_mark is None else x_mark.shape[2]
    V = N + M
    out_dtype = x.dtype

    w_t = weight.T                 # (L, D) — tiny, VMEM-resident inside the kernel
    b2 = bias.reshape(1, D)        # (1, D)
    if compute_dtype is not None:
        # Only the small weight is pre-cast; activation tiles are cast inside the kernel
        # so f32 inputs are read from HBM exactly once (no extra cast pass over HBM).
        w_t = w_t.astype(compute_dtype)

    x_bytes = jnp.dtype(x.dtype).itemsize
    w_bytes = jnp.dtype(w_t.dtype).itemsize
    out_bytes = jnp.dtype(out_dtype).itemsize

    auto_tv, auto_vmem = _auto_tile_and_vmem(L, D, M, V, x_bytes, w_bytes, out_bytes)
    if vmem_limit_bytes is None:
        vmem_limit_bytes = auto_vmem

    out_shape = jax.ShapeDtypeStruct((B, V, D), out_dtype)

    if N >= 128:
        # --- tiled, pipelined, megacore-parallel path ---------------------------------
        if token_tile is None:
            tv = auto_tv
        else:
            tv = max(128, (int(token_tile) // 128) * 128)

        gx = pl.cdiv(N, tv)     # x blocks along the token axis (last one may be partial)
        gt = pl.cdiv(V, tv)     # output blocks along the token axis

        w_spec = pl.BlockSpec((L, D), lambda b, j: (0, 0))
        b_spec = pl.BlockSpec((1, D), lambda b, j: (0, 0))
        out_spec = pl.BlockSpec((1, tv, D), lambda b, j: (b, j, 0))

        if gt == gx:
            x_spec = pl.BlockSpec((1, L, tv), lambda b, j: (b, 0, j))
        else:
            # Pure-mark overflow tile(s) only exist when N % tv == 0 and M > 0.  Clamp
            # to the last valid x block; the block index is identical to the previous
            # grid step's, so the pipeline elides the redundant HBM->VMEM copy.
            x_spec = pl.BlockSpec(
                (1, L, tv), lambda b, j: (b, 0, jnp.minimum(j, gx - 1))
            )

        if x_mark is None:
            kernel = functools.partial(_embed_kernel, compute_dtype=compute_dtype)
            operands = (x, w_t, b2)
            in_specs = [x_spec, w_spec, b_spec]
        else:
            xm_spec = pl.BlockSpec((1, L, M), lambda b, j: (b, 0, 0))
            kernel = functools.partial(
                _embed_mark_tiled_kernel, n_vars=N, compute_dtype=compute_dtype
            )
            operands = (x, x_mark, w_t, b2)
            in_specs = [x_spec, xm_spec, w_spec, b_spec]

        return pl.pallas_call(
            kernel,
            out_shape=out_shape,
            grid=(B, gt),
            in_specs=in_specs,
            out_specs=out_spec,
            compiler_params=pltpu.CompilerParams(
                dimension_semantics=("parallel", "parallel"),
                vmem_limit_bytes=int(vmem_limit_bytes),
            ),
        )(*operands)

    # --- small-N path: every block uses full array dims ------------------------------
    x_spec = pl.BlockSpec((1, L, N), lambda b: (b, 0, 0))
    w_spec = pl.BlockSpec((L, D), lambda b: (0, 0))
    b_spec = pl.BlockSpec((1, D), lambda b: (0, 0))
    out_spec = pl.BlockSpec((1, V, D), lambda b: (b, 0, 0))

    if x_mark is None:
        kernel = functools.partial(_embed_kernel, compute_dtype=compute_dtype)
        operands = (x, w_t, b2)
        in_specs = [x_spec, w_spec, b_spec]
    else:
        xm_spec = pl.BlockSpec((1, L, M), lambda b: (b, 0, 0))
        kernel = functools.partial(_embed_mark_full_kernel, compute_dtype=compute_dtype)
        operands = (x, x_mark, w_t, b2)
        in_specs = [x_spec, xm_spec, w_spec, b_spec]

    return pl.pallas_call(
        kernel,
        out_shape=out_shape,
        grid=(B,),
        in_specs=in_specs,
        out_specs=out_spec,
        compiler_params=pltpu.CompilerParams(
            dimension_semantics=("parallel",),
            vmem_limit_bytes=int(vmem_limit_bytes),
        ),
    )(*operands)


def _reference(x, x_mark, weight, bias):
    xt = jnp.transpose(x, (0, 2, 1))
    if x_mark is not None:
        xt = jnp.concatenate([xt, jnp.transpose(x_mark, (0, 2, 1))], axis=1)
    return xt @ weight.T + bias


if __name__ == "__main__":
    key = jax.random.PRNGKey(0)
    kx, km, kw, kb, kx2, km2, kw2, kb2, kx3, km3, kw3, kb3 = jax.random.split(key, 12)

    # ---- small shapes consistent with the module (c_in = seq_len L) ----
    B, L, N, M, D = 2, 8, 4, 3, 32
    x = jax.random.normal(kx, (B, L, N), dtype=jnp.float32)
    x_mark = jax.random.normal(km, (B, L, M), dtype=jnp.float32)
    bound = 1.0 / math.sqrt(L)
    weight = jax.random.uniform(kw, (D, L), minval=-bound, maxval=bound, dtype=jnp.float32)
    bias = jax.random.uniform(kb, (D,), minval=-bound, maxval=bound, dtype=jnp.float32)

    out = jax.block_until_ready(data_embedding_inverted(x, x_mark, weight, bias))
    assert out.shape == (B, N + M, D), out.shape
    assert jnp.allclose(out, _reference(x, x_mark, weight, bias), atol=1e-5, rtol=1e-5)

    out_nm = jax.block_until_ready(data_embedding_inverted(x, None, weight, bias))
    assert out_nm.shape == (B, N, D), out_nm.shape
    assert jnp.allclose(out_nm, _reference(x, None, weight, bias), atol=1e-5, rtol=1e-5)

    # ---- tiled / pipelined path with a partial last token block (N not /128) ----
    B2, L2, N2, M2, D2 = 2, 16, 160, 3, 128
    x2 = jax.random.normal(kx2, (B2, L2, N2), dtype=jnp.float32)
    xm2 = jax.random.normal(km2, (B2, L2, M2), dtype=jnp.float32)
    bound2 = 1.0 / math.sqrt(L2)
    w2 = jax.random.uniform(kw2, (D2, L2), minval=-bound2, maxval=bound2, dtype=jnp.float32)
    b2v = jax.random.uniform(kb2, (D2,), minval=-bound2, maxval=bound2, dtype=jnp.float32)
    ref2 = _reference(x2, xm2, w2, b2v)

    out2 = jax.block_until_ready(data_embedding_inverted(x2, xm2, w2, b2v))
    assert out2.shape == (B2, N2 + M2, D2), out2.shape
    assert jnp.allclose(out2, ref2, atol=1e-4, rtol=1e-4)

    out2_nm = jax.block_until_ready(data_embedding_inverted(x2, None, w2, b2v))
    assert out2_nm.shape == (B2, N2, D2), out2_nm.shape
    assert jnp.allclose(out2_nm, _reference(x2, None, w2, b2v), atol=1e-4, rtol=1e-4)

    # bf16 MXU feed (in-kernel cast) with f32 accumulation — looser tolerance.
    out2_bf16 = jax.block_until_ready(
        data_embedding_inverted(x2, xm2, w2, b2v, compute_dtype=jnp.bfloat16)
    )
    assert out2_bf16.shape == (B2, N2 + M2, D2)
    assert jnp.allclose(out2_bf16, ref2, atol=3e-2, rtol=3e-2)

    # ---- pure-mark overflow tile: N % tv == 0 with M > 0 (clamped x index map) ----
    B3, L3, N3, M3, D3 = 2, 16, 128, 3, 128
    x3 = jax.random.normal(kx3, (B3, L3, N3), dtype=jnp.float32)
    xm3 = jax.random.normal(km3, (B3, L3, M3), dtype=jnp.float32)
    bound3 = 1.0 / math.sqrt(L3)
    w3 = jax.random.uniform(kw3, (D3, L3), minval=-bound3, maxval=bound3, dtype=jnp.float32)
    b3v = jax.random.uniform(kb3, (D3,), minval=-bound3, maxval=bound3, dtype=jnp.float32)
    out3 = jax.block_until_ready(
        data_embedding_inverted(x3, xm3, w3, b3v, token_tile=128)
    )
    assert out3.shape == (B3, N3 + M3, D3), out3.shape
    assert jnp.allclose(out3, _reference(x3, xm3, w3, b3v), atol=1e-4, rtol=1e-4)

    print("KERNEL_OK")
</pallas_src>

<mosaic_0001>
module attributes {stable_mosaic.version = 11 : i64} {
  func.func @_embed_mark_full_kernel(%arg0: i32, %arg1: memref<1x8x4xf32, #tpu.memory_space<vmem>>, %arg2: memref<1x8x3xf32, #tpu.memory_space<vmem>>, %arg3: memref<8x32xf32, #tpu.memory_space<vmem>>, %arg4: memref<1x32xf32, #tpu.memory_space<vmem>>, %arg5: memref<1x7x32xf32, #tpu.memory_space<vmem>>) attributes {dimension_semantics = [#tpu.dimension_semantics<parallel>], iteration_bounds = array<i64: 2>, scalar_prefetch = 0 : i64, scratch_operands = 0 : i64, tpu.core_type = #tpu.core_type<tc>, window_params = [{transform_indices = @transform_0, window_bounds = array<i64: 1, 8, 4>}, {transform_indices = @transform_1, window_bounds = array<i64: 1, 8, 3>}, {pipeline_mode = #tpu.pipeline_mode<synchronous>, transform_indices = @transform_2, window_bounds = array<i64: 8, 32>}, {pipeline_mode = #tpu.pipeline_mode<synchronous>, transform_indices = @transform_3, window_bounds = array<i64: 1, 32>}, {transform_indices = @transform_4, window_bounds = array<i64: 1, 7, 32>}]} {
    %c0 = arith.constant 0 : index
    %c0_0 = arith.constant 0 : index
    %0 = vector.load %arg3[%c0, %c0_0] : memref<8x32xf32, #tpu.memory_space<vmem>>, vector<8x32xf32>
    %c0_1 = arith.constant 0 : index
    %c0_2 = arith.constant 0 : index
    %c0_3 = arith.constant 0 : index
    %1 = vector.load %arg1[%c0_1, %c0_2, %c0_3] : memref<1x8x4xf32, #tpu.memory_space<vmem>>, vector<1x8x4xf32>
    %2 = vector.shape_cast %1 : vector<1x8x4xf32> to vector<8x4xf32>
    %cst = arith.constant dense<0.000000e+00> : vector<4x32xf32>
    %3 = tpu.matmul %2, %0, %cst {dimension_numbers = #tpu.dot_dimension_numbers<[0], [0], [1], [1], [0, 1, 1, 1], [], []>} : vector<8x4xf32>, vector<8x32xf32>, vector<4x32xf32> -> vector<4x32xf32>
    %c0_4 = arith.constant 0 : index
    %c0_5 = arith.constant 0 : index
    %4 = vector.load %arg4[%c0_4, %c0_5] : memref<1x32xf32, #tpu.memory_space<vmem>>, vector<1x32xf32>
    %5 = vector.broadcast %4 : vector<1x32xf32> to vector<4x32xf32>
    %6 = arith.addf %3, %5 : vector<4x32xf32>
    %c0_6 = arith.constant 0 : index
    %c0_7 = arith.constant 0 : index
    %c0_8 = arith.constant 0 : index
    %7 = vector.load %arg2[%c0_6, %c0_7, %c0_8] : memref<1x8x3xf32, #tpu.memory_space<vmem>>, vector<1x8x3xf32>
    %8 = vector.shape_cast %7 : vector<1x8x3xf32> to vector<8x3xf32>
    %cst_9 = arith.constant dense<0.000000e+00> : vector<3x32xf32>
    %9 = tpu.matmul %8, %0, %cst_9 {dimension_numbers = #tpu.dot_dimension_numbers<[0], [0], [1], [1], [0, 1, 1, 1], [], []>} : vector<8x3xf32>, vector<8x32xf32>, vector<3x32xf32> -> vector<3x32xf32>
    %c0_10 = arith.constant 0 : index
    %c0_11 = arith.constant 0 : index
    %10 = vector.load %arg4[%c0_10, %c0_11] : memref<1x32xf32, #tpu.memory_space<vmem>>, vector<1x32xf32>
    %11 = vector.broadcast %10 : vector<1x32xf32> to vector<3x32xf32>
    %12 = arith.addf %9, %11 : vector<3x32xf32>
    %c0_12 = arith.constant 0 : index
    %c0_13 = arith.constant 0 : index
    %c0_14 = arith.constant 0 : index
    %13 = vector.load %arg5[%c0_12, %c0_13, %c0_14] : memref<1x7x32xf32, #tpu.memory_space<vmem>>, vector<1x4x32xf32>
    %14 = vector.shape_cast %13 : vector<1x4x32xf32> to vector<4x32xf32>
    %15 = vector.shape_cast %6 : vector<4x32xf32> to vector<1x4x32xf32>
    tpu.vector_store %arg5[%c0_12, %c0_13, %c0_14], %15 {strides = array<i32>} : memref<1x7x32xf32, #tpu.memory_space<vmem>>, vector<1x4x32xf32>,
    %c0_15 = arith.constant 0 : index
    %c4 = arith.constant 4 : index
    %c0_16 = arith.constant 0 : index
    %16 = vector.load %arg5[%c0_15, %c4, %c0_16] : memref<1x7x32xf32, #tpu.memory_space<vmem>>, vector<1x3x32xf32>
    %17 = vector.shape_cast %16 : vector<1x3x32xf32> to vector<3x32xf32>
    %18 = vector.shape_cast %12 : vector<3x32xf32> to vector<1x3x32xf32>
    tpu.vector_store %arg5[%c0_15, %c4, %c0_16], %18 {strides = array<i32>} : memref<1x7x32xf32, #tpu.memory_space<vmem>>, vector<1x3x32xf32>,
    return
  }
  func.func @transform_0(%arg0: i32) -> (i32, i32, i32) {
    %c0_i32 = arith.constant 0 : i32
    %c0_i32_0 = arith.constant 0 : i32
    %c0_i32_1 = arith.constant 0 : i32
    return %arg0, %c0_i32, %c0_i32_0 : i32, i32, i32
  }
  func.func @transform_1(%arg0: i32) -> (i32, i32, i32) {
    %c0_i32 = arith.constant 0 : i32
    %c0_i32_0 = arith.constant 0 : i32
    %c0_i32_1 = arith.constant 0 : i32
    return %arg0, %c0_i32, %c0_i32_0 : i32, i32, i32
  }
  func.func @transform_2(%arg0: i32) -> (i32, i32) {
    %c0_i32 = arith.constant 0 : i32
    %c0_i32_0 = arith.constant 0 : i32
    %c0_i32_1 = arith.constant 0 : i32
    return %c0_i32, %c0_i32_0 : i32, i32
  }
  func.func @transform_3(%arg0: i32) -> (i32, i32) {
    %c0_i32 = arith.constant 0 : i32
    %c0_i32_0 = arith.constant 0 : i32
    %c0_i32_1 = arith.constant 0 : i32
    return %c0_i32, %c0_i32_0 : i32, i32
  }
  func.func @transform_4(%arg0: i32) -> (i32, i32, i32) {
    %c0_i32 = arith.constant 0 : i32
    %c0_i32_0 = arith.constant 0 : i32
    %c0_i32_1 = arith.constant 0 : i32
    return %arg0, %c0_i32, %c0_i32_0 : i32, i32, i32
  }
}

</mosaic_0001>

<bundles_post_ra>
// kernel: tpu_custom_call.1
= control target key start
LH: loop header
LB: loop body
LE: loop exit
PB: predicated region body
PF: predicated region fallthrough
CT: control target
= control target key end

     0   :  { %s572_s15 = smov 0   ;;  %s598_s0 = inlined_call_operand.vmem [shape: f32[2,8,4], index: 0, kind: input, shape index: {}]   ;;  %s599_s1 = inlined_call_operand.vmem [shape: f32[2,8,3], index: 1, kind: input, shape index: {}]   ;;  %s600_s2 = inlined_call_operand.vmem [shape: f32[8,32], index: 2, kind: input, shape index: {}]   ;;  %s601_s3 = inlined_call_operand.vmem [shape: f32[1,32], index: 3, kind: input, shape index: {}]   ;;  %s602_s4 = inlined_call_operand.vmem [shape: f32[2,7,32], index: 4, kind: output, shape index: {}]  }
   0x1 LB: > { %s500_s16 = sadd.s32 4294967295, %s543_s15   ;;  %p504_p0 = scmp.ge.s32.totalorder %s543_s15, 1  ;;  %s543_s15 = sphi %s572_s15, %s14_s15  }
   0x2   : > { %p170_p1 = scmp.lt.s32.totalorder %s543_s15, 3 }
   0x4   : > { %p171_p2 = pnand %p504_p0, %p170_p1 }
   0x5   : > { %p198_p3 = scmp.lt.s32.totalorder (!%p171_p2), %s500_s16, 1  ;;  %v210_v0 = vld [vmem:[%s600_s2] sm:$0xff] (!%p171_p2)  ;;  %v545_v1 = vmov (!%p171_p2), 0.0   ;;  %vm546_vm0 = vmmov (!%p171_p2), 0   ;;  %vm251_vm1 = vcmask (!%p171_p2), 64512   ;;  %vm431_vm2 = vcmask (!%p171_p2), 257024  }
   0x6   : > { %174 = sbr.rel (%p171_p2) target bundleno = 365 (0x16d), region = 36  ;;  %517 = vmatprep.subr.mxu0 (!%p171_p2), %v545_v1  ;;  %519 = vmatprep.mubr.msk.f32.mxu0 (!%p171_p2), %vm546_vm0, %v545_v1  ;;  %v508_v6 = vld [vmem:[%s601_s3] ss:$0 sm:$0xff] (!%p171_p2)  ;;  %vm433_vm3 = vcmask (!%p171_p2), 256000  }
   0x7   : > { %518 = vmatpush3.msra.mxu0 (!%p171_p2), %v210_v0  ;;  %522 = vmatprep.subr.mxu1 (!%p171_p2), %v545_v1 }
   0x8   : > { %523 = vmatpush3.msra.mxu1 (!%p171_p2), %v210_v0  ;;  %524 = vmatprep.mubr.msk.f32.mxu1 (!%p171_p2), %vm546_vm0, %v545_v1 }
   0xd   : > { %s604_s16 = smov (!%p198_p3, %s500_s16), 1 }
   0xe   : > { %s505_s19 = sshll.u32 %s604_s16, 3 }
   0xf   : > { %s201_s22 = scalar_lea.vmem %s598_s0, %s505_s19  ;;  %s205_s25 = scalar_lea.vmem %s599_s1, %s505_s19 }
  0x10   : > { %v211_v2 = vld [vmem:[%s201_s22] sm:$0xff]  ;;  %s209_s30 = scalar_lea.vmem %s602_s4, %s505_s19 }
  0x11   : > { %219 = vxpose.xlu0.b32.start.end [1/1] (short) (narrow) %v211_v2, 8  ;;  %v325_v3 = vld [vmem:[%s205_s25] sm:$0xff] }
  0x15   : > { %326 = vxpose.xlu0.b32.start.end [1/1] (short) (narrow) %v325_v3, 8 }
  0x91   : > { %v235_v4 = vpop.trf.xlu0 }
  0x92   : > { %520 = vmatmul.mubr.msk.f32.vlgmr.msra.gmra.mrb[0].mxu0 %vm251_vm1, %v235_v4 }
  0x95   : > { %v342_v5 = vpop.trf.xlu0 }
  0x96   : > { %525 = vmatmul.mubr.msk.f32.vlgmr.msra.gmra.mrb[0].mxu1 %vm251_vm1, %v342_v5 }
 0x165   : > { %v321_v7 = vpop.f32.mrb[0].mxu0 }
 0x166   : > { %v322_v8 = vadd.f32 %v508_v6, %v321_v7  ;;  %v521_v9 = vpop.f32.mrb[1].mxu0 }
 0x168   : > { %432 = vst.msk [vmem:[%s209_s30] sm:$0xf] %vm431_vm2, %v322_v8 }
 0x169   : > { %v427_v10 = vpop.f32.mrb[0].mxu1 }
 0x16a   : > { %v428_v11 = vadd.f32 %v508_v6, %v427_v10  ;;  %v526_v12 = vpop.f32.mrb[1].mxu1 }
 0x16c   : > { %434 = vst.msk [vmem:[%s209_s30 + $0x4] sm:$0x7] %vm433_vm3, %v428_v11 }
 0x16d PF: > { %s14_s15 = sadd.s32 1, %s543_s15  }
 0x16e   : > { %p11_p4 = scmp.ge.s32.totalorder %s14_s15, 4  }
 0x170   :  { %13 = sbr.rel (!%p11_p4) target bundleno = 1 (0x1), region = 69 }

</bundles_post_ra>
